<compile_context>
chip_gen: v6e
topology: v6e:2x2x1
jax: 0.10.0
libtpu: 0.0.40
codegen_flags: <defaults>
</compile_context>

<pallas_src>
import functools

import jax
import jax.numpy as jnp
from jax.experimental import pallas as pl
from jax.experimental.pallas import tpu as pltpu

EPS = 1e-5


# ----------------------------------------------------------------------------
# Fused kernel for ONE pixel-shuffle group (G = r*r mid-channels):
#   x_ref    : (Cin, Mpad + 2*guard)  zero-padded input, flat (n, h, w) on lanes
#   mask_ref : (1, Mpad)              1.0 at valid (interior image) positions
#   w_ref    : (1, 9, G, Cin)         conv taps for this group, t = ky*3 + kx
#   p_ref    : (1, G, 4)              per-channel [gamma1, beta1, gamma2, beta2]
#   o_ref    : (1, G, Mpad)           pre-pixel-shuffle output (post BN2+ReLU2)
# ----------------------------------------------------------------------------
def _decoder_fused_kernel(x_ref, mask_ref, w_ref, p_ref, o_ref, *,
                          wpad, guard, m_valid):
    grp = o_ref.shape[1]
    mpad = o_ref.shape[2]
    mask = mask_ref[...]                                      # (1, Mpad)

    # ---- conv3x3: nine shifted-tap matmuls accumulated in f32 --------------
    # TODO(synk): cast operands to bf16 (keep f32 accumulation) for production
    # sizes to halve DMA bytes / VMEM; kept f32 here for a tight 1e-4 check.
    y = jnp.zeros((grp, mpad), jnp.float32)
    for t in range(9):
        ky, kx = t // 3, t % 3
        shift = (ky - 1) * wpad + (kx - 1)
        xt = x_ref[:, pl.ds(guard + shift, mpad)]             # (Cin, Mpad) view
        y = y + jnp.dot(w_ref[0, t], xt,
                        preferred_element_type=jnp.float32)

    # ---- BN1 (training-mode batch stats over valid positions) + ReLU1 ------
    inv_m = 1.0 / m_valid
    ym = y * mask
    s1 = jnp.sum(ym, axis=1, keepdims=True)                   # (G, 1)
    s2 = jnp.sum(ym * y, axis=1, keepdims=True)
    mean1 = s1 * inv_m
    var1 = jnp.maximum(s2 * inv_m - mean1 * mean1, 0.0)
    p = p_ref[0]                                               # (G, 4)
    scale1 = p[:, 0:1] * jax.lax.rsqrt(var1 + EPS)
    shift1 = p[:, 1:2] - mean1 * scale1
    o_ref[0] = jnp.maximum(y * scale1 + shift1, 0.0)           # h staged in o_ref

    # ---- BN2 + ReLU2 over the pixel-shuffle group ---------------------------
    # Post-shuffle output channel c is exactly the union of this block's G
    # rows, so its batch statistics are the pooled stats of the block.
    h = o_ref[0]
    hm = h * mask
    rs = jnp.sum(hm, axis=1, keepdims=True)                    # (G, 1)
    rs2 = jnp.sum(hm * h, axis=1, keepdims=True)
    inv_gm = 1.0 / (grp * m_valid)
    mean2 = jnp.sum(rs, axis=0, keepdims=True) * inv_gm        # (1, 1)
    var2 = jnp.maximum(jnp.sum(rs2, axis=0, keepdims=True) * inv_gm
                       - mean2 * mean2, 0.0)
    scale2 = p[:, 2:3] * jax.lax.rsqrt(var2 + EPS)             # (G, 1)
    shift2 = p[:, 3:4] - mean2 * scale2
    o_ref[0] = jnp.maximum(h * scale2 + shift2, 0.0)


# ----------------------------------------------------------------------------
# Full DecoderBlock forward (pixelshuffle mode, BN_enable=True), NCHW in/out.
# ----------------------------------------------------------------------------
@jax.jit
def decoder_block_forward(x_nchw, conv_w, gamma1, beta1, gamma2, beta2):
    N, Cin, H, W = x_nchw.shape
    Cmid = conv_w.shape[0]
    r = 2
    g = r * r
    Cout = Cmid // g
    Hp, Wp = H + 2, W + 2
    Mp = N * Hp * Wp                         # padded spatial, flattened
    Mpad = pl.cdiv(Mp, 128) * 128            # lane-dense (multiple of 128)
    M = N * H * W                            # valid positions (BN1 divisor)
    guard = pl.cdiv(Wp + 1, 128) * 128       # lane guard covering all 9 shifts

    # --- padded input -> (Cin, guard + Mpad + guard), spatial on lanes -------
    xpad = jnp.pad(x_nchw, ((0, 0), (0, 0), (1, 1), (1, 1)))
    xf = jnp.transpose(xpad, (1, 0, 2, 3)).reshape(Cin, Mp).astype(jnp.float32)
    xf = jnp.pad(xf, ((0, 0), (guard, guard + Mpad - Mp)))

    # --- conv weight -> (Cout, 9, g, Cin); mid-channel index k = c*g + j ----
    w = jnp.transpose(conv_w, (0, 2, 3, 1)).reshape(Cmid, 9, Cin)
    w = w.reshape(Cout, g, 9, Cin)
    w = jnp.transpose(w, (0, 2, 1, 3)).astype(jnp.float32)     # (Cout, 9, g, Cin)

    # --- BN params packed per mid-channel: [gamma1, beta1, gamma2, beta2] ---
    params = jnp.stack(
        [gamma1.reshape(Cout, g), beta1.reshape(Cout, g),
         jnp.broadcast_to(gamma2.reshape(Cout, 1), (Cout, g)),
         jnp.broadcast_to(beta2.reshape(Cout, 1), (Cout, g))],
        axis=-1).astype(jnp.float32)                            # (Cout, g, 4)

    # --- validity mask over the padded, lane-padded flat grid ---------------
    idx = jnp.arange(Mpad, dtype=jnp.int32)
    rem = idx % (Hp * Wp)
    hh, ww = rem // Wp, rem % Wp
    valid = (idx < Mp) & (hh >= 1) & (hh <= H) & (ww >= 1) & (ww <= W)
    mask = valid.astype(jnp.float32).reshape(1, Mpad)

    kernel = functools.partial(_decoder_fused_kernel,
                               wpad=Wp, guard=guard, m_valid=M)

    # TODO(synk): for shapes where (Cmid, Mpad) exceeds VMEM, add a second
    # ("arbitrary") Mpad grid axis with a 3-phase BN (conv+stats1 ->
    # apply1+stats2 -> apply2), block several groups per step to fill the MXU,
    # and re-budget tiles for v7x's 64 MiB VMEM via vmem_limit_bytes.
    out = pl.pallas_call(
        kernel,
        out_shape=jax.ShapeDtypeStruct((Cout, g, Mpad), jnp.float32),
        grid=(Cout,),
        in_specs=[
            pl.BlockSpec((Cin, Mpad + 2 * guard), lambda c: (0, 0)),  # resident
            pl.BlockSpec((1, Mpad), lambda c: (0, 0)),                # resident
            pl.BlockSpec((1, 9, g, Cin), lambda c: (c, 0, 0, 0)),
            pl.BlockSpec((1, g, 4), lambda c: (c, 0, 0)),
        ],
        out_specs=pl.BlockSpec((1, g, Mpad), lambda c: (c, 0, 0)),
        compiler_params=pltpu.CompilerParams(
            dimension_semantics=("parallel",)),
    )(xf, mask, w, params)

    # --- PixelShuffle(2): crop interior + interleave (wrapper layout glue) --
    # TODO(synk): emit lane-interleaved stores in-kernel to drop this transpose.
    y = out[:, :, :Mp].reshape(Cout, r, r, N, Hp, Wp)          # (c, i, j, n, hp, wp)
    y = y[:, :, :, :, 1:H + 1, 1:W + 1]                        # (c, i, j, n, H, W)
    y = jnp.transpose(y, (3, 0, 4, 1, 5, 2))                   # (n, c, H, i, W, j)
    return y.reshape(N, Cout, r * H, r * W)


# ----------------------------------------------------------------------------
# Pure-JAX reference (mirrors the PyTorch forward in NCHW, training-mode BN).
# ----------------------------------------------------------------------------
def reference_forward(x_nchw, conv_w, gamma1, beta1, gamma2, beta2):
    y = jax.lax.conv_general_dilated(
        x_nchw, conv_w, window_strides=(1, 1), padding=((1, 1), (1, 1)),
        dimension_numbers=("NCHW", "OIHW", "NCHW"))

    def bn_relu_nchw(t, gm, bt):
        mean = jnp.mean(t, axis=(0, 2, 3), keepdims=True)
        var = jnp.mean((t - mean) ** 2, axis=(0, 2, 3), keepdims=True)
        t = (t - mean) * jax.lax.rsqrt(var + EPS)
        t = t * gm.reshape(1, -1, 1, 1) + bt.reshape(1, -1, 1, 1)
        return jnp.maximum(t, 0.0)

    y = bn_relu_nchw(y, gamma1, beta1)
    N, C, H, W = y.shape
    r = 2
    Cout = C // (r * r)
    y = y.reshape(N, Cout, r, r, H, W)
    y = jnp.transpose(y, (0, 1, 4, 2, 5, 3)).reshape(N, Cout, H * r, W * r)
    y = bn_relu_nchw(y, gamma2, beta2)
    return y


if __name__ == "__main__":
    # Small shapes consistent with the module: pixelshuffle => out = mid // 4.
    N, Cin, H, W = 2, 4, 16, 16
    Cmid, Cout = 16, 4

    key = jax.random.PRNGKey(0)
    k1, k2, k3, k4, k5, k6 = jax.random.split(key, 6)

    x = jax.random.normal(k1, (N, Cin, H, W), jnp.float32)
    conv_w = jax.random.normal(k2, (Cmid, Cin, 3, 3), jnp.float32) * 0.1
    # BatchNorm affine params (PyTorch inits to 1/0; perturb deterministically).
    gamma1 = 1.0 + 0.1 * jax.random.normal(k3, (Cmid,), jnp.float32)
    beta1 = 0.1 * jax.random.normal(k4, (Cmid,), jnp.float32)
    gamma2 = 1.0 + 0.1 * jax.random.normal(k5, (Cout,), jnp.float32)
    beta2 = 0.1 * jax.random.normal(k6, (Cout,), jnp.float32)

    out = decoder_block_forward(x, conv_w, gamma1, beta1, gamma2, beta2)
    out = jax.block_until_ready(out)

    ref = reference_forward(x, conv_w, gamma1, beta1, gamma2, beta2)
    assert out.shape == (N, Cout, 2 * H, 2 * W), out.shape
    assert jnp.allclose(out, ref, rtol=1e-4, atol=1e-4), \
        float(jnp.max(jnp.abs(out - ref)))

    print("KERNEL_OK")
</pallas_src>

<mosaic_0001>
module attributes {stable_mosaic.version = 11 : i64} {
  func.func @_decoder_fused_kernel(%arg0: i32, %arg1: memref<4x1024xf32, #tpu.memory_space<vmem>>, %arg2: memref<1x768xf32, #tpu.memory_space<vmem>>, %arg3: memref<1x9x4x4xf32, #tpu.memory_space<vmem>>, %arg4: memref<1x4x4xf32, #tpu.memory_space<vmem>>, %arg5: memref<1x4x768xf32, #tpu.memory_space<vmem>>) attributes {dimension_semantics = [#tpu.dimension_semantics<parallel>], iteration_bounds = array<i64: 4>, scalar_prefetch = 0 : i64, scratch_operands = 0 : i64, tpu.core_type = #tpu.core_type<tc>, window_params = [{pipeline_mode = #tpu.pipeline_mode<synchronous>, transform_indices = @transform_0, window_bounds = array<i64: 4, 1024>}, {pipeline_mode = #tpu.pipeline_mode<synchronous>, transform_indices = @transform_1, window_bounds = array<i64: 1, 768>}, {transform_indices = @transform_2, window_bounds = array<i64: 1, 9, 4, 4>}, {transform_indices = @transform_3, window_bounds = array<i64: 1, 4, 4>}, {transform_indices = @transform_4, window_bounds = array<i64: 1, 4, 768>}]} {
    %c0 = arith.constant 0 : index
    %c0_0 = arith.constant 0 : index
    %0 = vector.load %arg2[%c0, %c0_0] : memref<1x768xf32, #tpu.memory_space<vmem>>, vector<1x768xf32>
    %cst = arith.constant 0.000000e+00 : f32
    %1 = vector.broadcast %cst : f32 to vector<4x768xf32>
    %c0_1 = arith.constant 0 : index
    %c109 = arith.constant 109 : index
    %2 = vector.load %arg1[%c0_1, %c109] : memref<4x1024xf32, #tpu.memory_space<vmem>>, vector<4x768xf32>
    %c0_2 = arith.constant 0 : index
    %c0_3 = arith.constant 0 : index
    %c0_4 = arith.constant 0 : index
    %c0_5 = arith.constant 0 : index
    %3 = vector.load %arg3[%c0_2, %c0_3, %c0_4, %c0_5] : memref<1x9x4x4xf32, #tpu.memory_space<vmem>>, vector<1x1x4x4xf32>
    %4 = vector.shape_cast %3 : vector<1x1x4x4xf32> to vector<4x4xf32>
    %cst_6 = arith.constant dense<0.000000e+00> : vector<4x768xf32>
    %5 = tpu.matmul %4, %2, %cst_6 {dimension_numbers = #tpu.dot_dimension_numbers<[1], [0], [0], [1], [0, 0, 1, 1], [], []>} : vector<4x4xf32>, vector<4x768xf32>, vector<4x768xf32> -> vector<4x768xf32>
    %6 = arith.addf %1, %5 : vector<4x768xf32>
    %c0_7 = arith.constant 0 : index
    %c110 = arith.constant 110 : index
    %7 = vector.load %arg1[%c0_7, %c110] : memref<4x1024xf32, #tpu.memory_space<vmem>>, vector<4x768xf32>
    %c0_8 = arith.constant 0 : index
    %c1 = arith.constant 1 : index
    %c0_9 = arith.constant 0 : index
    %c0_10 = arith.constant 0 : index
    %8 = vector.load %arg3[%c0_8, %c1, %c0_9, %c0_10] : memref<1x9x4x4xf32, #tpu.memory_space<vmem>>, vector<1x1x4x4xf32>
    %9 = vector.shape_cast %8 : vector<1x1x4x4xf32> to vector<4x4xf32>
    %cst_11 = arith.constant dense<0.000000e+00> : vector<4x768xf32>
    %10 = tpu.matmul %9, %7, %cst_11 {dimension_numbers = #tpu.dot_dimension_numbers<[1], [0], [0], [1], [0, 0, 1, 1], [], []>} : vector<4x4xf32>, vector<4x768xf32>, vector<4x768xf32> -> vector<4x768xf32>
    %11 = arith.addf %6, %10 : vector<4x768xf32>
    %c0_12 = arith.constant 0 : index
    %c111 = arith.constant 111 : index
    %12 = vector.load %arg1[%c0_12, %c111] : memref<4x1024xf32, #tpu.memory_space<vmem>>, vector<4x768xf32>
    %c0_13 = arith.constant 0 : index
    %c2 = arith.constant 2 : index
    %c0_14 = arith.constant 0 : index
    %c0_15 = arith.constant 0 : index
    %13 = vector.load %arg3[%c0_13, %c2, %c0_14, %c0_15] : memref<1x9x4x4xf32, #tpu.memory_space<vmem>>, vector<1x1x4x4xf32>
    %14 = vector.shape_cast %13 : vector<1x1x4x4xf32> to vector<4x4xf32>
    %cst_16 = arith.constant dense<0.000000e+00> : vector<4x768xf32>
    %15 = tpu.matmul %14, %12, %cst_16 {dimension_numbers = #tpu.dot_dimension_numbers<[1], [0], [0], [1], [0, 0, 1, 1], [], []>} : vector<4x4xf32>, vector<4x768xf32>, vector<4x768xf32> -> vector<4x768xf32>
    %16 = arith.addf %11, %15 : vector<4x768xf32>
    %c0_17 = arith.constant 0 : index
    %c127 = arith.constant 127 : index
    %17 = vector.load %arg1[%c0_17, %c127] : memref<4x1024xf32, #tpu.memory_space<vmem>>, vector<4x768xf32>
    %c0_18 = arith.constant 0 : index
    %c3 = arith.constant 3 : index
    %c0_19 = arith.constant 0 : index
    %c0_20 = arith.constant 0 : index
    %18 = vector.load %arg3[%c0_18, %c3, %c0_19, %c0_20] : memref<1x9x4x4xf32, #tpu.memory_space<vmem>>, vector<1x1x4x4xf32>
    %19 = vector.shape_cast %18 : vector<1x1x4x4xf32> to vector<4x4xf32>
    %cst_21 = arith.constant dense<0.000000e+00> : vector<4x768xf32>
    %20 = tpu.matmul %19, %17, %cst_21 {dimension_numbers = #tpu.dot_dimension_numbers<[1], [0], [0], [1], [0, 0, 1, 1], [], []>} : vector<4x4xf32>, vector<4x768xf32>, vector<4x768xf32> -> vector<4x768xf32>
    %21 = arith.addf %16, %20 : vector<4x768xf32>
    %c0_22 = arith.constant 0 : index
    %c128 = arith.constant 128 : index
    %22 = vector.load %arg1[%c0_22, %c128] : memref<4x1024xf32, #tpu.memory_space<vmem>>, vector<4x768xf32>
    %c0_23 = arith.constant 0 : index
    %c4 = arith.constant 4 : index
    %c0_24 = arith.constant 0 : index
    %c0_25 = arith.constant 0 : index
    %23 = vector.load %arg3[%c0_23, %c4, %c0_24, %c0_25] : memref<1x9x4x4xf32, #tpu.memory_space<vmem>>, vector<1x1x4x4xf32>
    %24 = vector.shape_cast %23 : vector<1x1x4x4xf32> to vector<4x4xf32>
    %cst_26 = arith.constant dense<0.000000e+00> : vector<4x768xf32>
    %25 = tpu.matmul %24, %22, %cst_26 {dimension_numbers = #tpu.dot_dimension_numbers<[1], [0], [0], [1], [0, 0, 1, 1], [], []>} : vector<4x4xf32>, vector<4x768xf32>, vector<4x768xf32> -> vector<4x768xf32>
    %26 = arith.addf %21, %25 : vector<4x768xf32>
    %c0_27 = arith.constant 0 : index
    %c129 = arith.constant 129 : index
    %27 = vector.load %arg1[%c0_27, %c129] : memref<4x1024xf32, #tpu.memory_space<vmem>>, vector<4x768xf32>
    %c0_28 = arith.constant 0 : index
    %c5 = arith.constant 5 : index
    %c0_29 = arith.constant 0 : index
    %c0_30 = arith.constant 0 : index
    %28 = vector.load %arg3[%c0_28, %c5, %c0_29, %c0_30] : memref<1x9x4x4xf32, #tpu.memory_space<vmem>>, vector<1x1x4x4xf32>
    %29 = vector.shape_cast %28 : vector<1x1x4x4xf32> to vector<4x4xf32>
    %cst_31 = arith.constant dense<0.000000e+00> : vector<4x768xf32>
    %30 = tpu.matmul %29, %27, %cst_31 {dimension_numbers = #tpu.dot_dimension_numbers<[1], [0], [0], [1], [0, 0, 1, 1], [], []>} : vector<4x4xf32>, vector<4x768xf32>, vector<4x768xf32> -> vector<4x768xf32>
    %31 = arith.addf %26, %30 : vector<4x768xf32>
    %c0_32 = arith.constant 0 : index
    %c145 = arith.constant 145 : index
    %32 = vector.load %arg1[%c0_32, %c145] : memref<4x1024xf32, #tpu.memory_space<vmem>>, vector<4x768xf32>
    %c0_33 = arith.constant 0 : index
    %c6 = arith.constant 6 : index
    %c0_34 = arith.constant 0 : index
    %c0_35 = arith.constant 0 : index
    %33 = vector.load %arg3[%c0_33, %c6, %c0_34, %c0_35] : memref<1x9x4x4xf32, #tpu.memory_space<vmem>>, vector<1x1x4x4xf32>
    %34 = vector.shape_cast %33 : vector<1x1x4x4xf32> to vector<4x4xf32>
    %cst_36 = arith.constant dense<0.000000e+00> : vector<4x768xf32>
    %35 = tpu.matmul %34, %32, %cst_36 {dimension_numbers = #tpu.dot_dimension_numbers<[1], [0], [0], [1], [0, 0, 1, 1], [], []>} : vector<4x4xf32>, vector<4x768xf32>, vector<4x768xf32> -> vector<4x768xf32>
    %36 = arith.addf %31, %35 : vector<4x768xf32>
    %c0_37 = arith.constant 0 : index
    %c146 = arith.constant 146 : index
    %37 = vector.load %arg1[%c0_37, %c146] : memref<4x1024xf32, #tpu.memory_space<vmem>>, vector<4x768xf32>
    %c0_38 = arith.constant 0 : index
    %c7 = arith.constant 7 : index
    %c0_39 = arith.constant 0 : index
    %c0_40 = arith.constant 0 : index
    %38 = vector.load %arg3[%c0_38, %c7, %c0_39, %c0_40] : memref<1x9x4x4xf32, #tpu.memory_space<vmem>>, vector<1x1x4x4xf32>
    %39 = vector.shape_cast %38 : vector<1x1x4x4xf32> to vector<4x4xf32>
    %cst_41 = arith.constant dense<0.000000e+00> : vector<4x768xf32>
    %40 = tpu.matmul %39, %37, %cst_41 {dimension_numbers = #tpu.dot_dimension_numbers<[1], [0], [0], [1], [0, 0, 1, 1], [], []>} : vector<4x4xf32>, vector<4x768xf32>, vector<4x768xf32> -> vector<4x768xf32>
    %41 = arith.addf %36, %40 : vector<4x768xf32>
    %c0_42 = arith.constant 0 : index
    %c147 = arith.constant 147 : index
    %42 = vector.load %arg1[%c0_42, %c147] : memref<4x1024xf32, #tpu.memory_space<vmem>>, vector<4x768xf32>
    %c0_43 = arith.constant 0 : index
    %c8 = arith.constant 8 : index
    %c0_44 = arith.constant 0 : index
    %c0_45 = arith.constant 0 : index
    %43 = vector.load %arg3[%c0_43, %c8, %c0_44, %c0_45] : memref<1x9x4x4xf32, #tpu.memory_space<vmem>>, vector<1x1x4x4xf32>
    %44 = vector.shape_cast %43 : vector<1x1x4x4xf32> to vector<4x4xf32>
    %cst_46 = arith.constant dense<0.000000e+00> : vector<4x768xf32>
    %45 = tpu.matmul %44, %42, %cst_46 {dimension_numbers = #tpu.dot_dimension_numbers<[1], [0], [0], [1], [0, 0, 1, 1], [], []>} : vector<4x4xf32>, vector<4x768xf32>, vector<4x768xf32> -> vector<4x768xf32>
    %46 = arith.addf %41, %45 : vector<4x768xf32>
    %47 = vector.broadcast %0 : vector<1x768xf32> to vector<4x768xf32>
    %48 = arith.mulf %46, %47 : vector<4x768xf32>
    %cst_47 = arith.constant dense<0.000000e+00> : vector<4xf32>
    %49 = vector.multi_reduction <add>, %48, %cst_47 [1] : vector<4x768xf32> to vector<4xf32>
    %50 = vector.shape_cast %49 : vector<4xf32> to vector<4x1xf32>
    %51 = arith.mulf %48, %46 : vector<4x768xf32>
    %cst_48 = arith.constant dense<0.000000e+00> : vector<4xf32>
    %52 = vector.multi_reduction <add>, %51, %cst_48 [1] : vector<4x768xf32> to vector<4xf32>
    %53 = vector.shape_cast %52 : vector<4xf32> to vector<4x1xf32>
    %cst_49 = arith.constant 0.001953125 : f32
    %54 = vector.broadcast %cst_49 : f32 to vector<4x1xf32>
    %55 = arith.mulf %50, %54 : vector<4x1xf32>
    %cst_50 = arith.constant 0.001953125 : f32
    %56 = vector.broadcast %cst_50 : f32 to vector<4x1xf32>
    %57 = arith.mulf %53, %56 : vector<4x1xf32>
    %58 = arith.mulf %55, %55 : vector<4x1xf32>
    %59 = arith.subf %57, %58 : vector<4x1xf32>
    %cst_51 = arith.constant 0.000000e+00 : f32
    %60 = vector.broadcast %cst_51 : f32 to vector<4x1xf32>
    %61 = arith.maximumf %59, %60 : vector<4x1xf32>
    %c0_52 = arith.constant 0 : index
    %c0_53 = arith.constant 0 : index
    %c0_54 = arith.constant 0 : index
    %62 = vector.load %arg4[%c0_52, %c0_53, %c0_54] : memref<1x4x4xf32, #tpu.memory_space<vmem>>, vector<1x4x4xf32>
    %63 = vector.shape_cast %62 : vector<1x4x4xf32> to vector<4x4xf32>
    %64 = vector.extract_strided_slice %63 {offsets = [0, 0], sizes = [4, 1], strides = [1, 1]} : vector<4x4xf32> to vector<4x1xf32>
    %cst_55 = arith.constant 9.99999974E-6 : f32
    %65 = vector.broadcast %cst_55 : f32 to vector<4x1xf32>
    %66 = arith.addf %61, %65 : vector<4x1xf32>
    %67 = math.rsqrt %66 : vector<4x1xf32>
    %68 = arith.mulf %64, %67 : vector<4x1xf32>
    %69 = vector.extract_strided_slice %63 {offsets = [0, 1], sizes = [4, 1], strides = [1, 1]} : vector<4x4xf32> to vector<4x1xf32>
    %70 = arith.mulf %55, %68 : vector<4x1xf32>
    %71 = arith.subf %69, %70 : vector<4x1xf32>
    %72 = vector.broadcast %68 : vector<4x1xf32> to vector<4x768xf32>
    %73 = arith.mulf %46, %72 : vector<4x768xf32>
    %74 = vector.broadcast %71 : vector<4x1xf32> to vector<4x768xf32>
    %75 = arith.addf %73, %74 : vector<4x768xf32>
    %cst_56 = arith.constant 0.000000e+00 : f32
    %76 = vector.broadcast %cst_56 : f32 to vector<4x768xf32>
    %77 = arith.maximumf %75, %76 : vector<4x768xf32>
    %c0_57 = arith.constant 0 : index
    %c0_58 = arith.constant 0 : index
    %c0_59 = arith.constant 0 : index
    %78 = vector.load %arg5[%c0_57, %c0_58, %c0_59] : memref<1x4x768xf32, #tpu.memory_space<vmem>>, vector<1x4x768xf32>
    %79 = vector.shape_cast %78 : vector<1x4x768xf32> to vector<4x768xf32>
    %80 = vector.shape_cast %77 : vector<4x768xf32> to vector<1x4x768xf32>
    tpu.vector_store %arg5[%c0_57, %c0_58, %c0_59], %80 {strides = array<i32>} : memref<1x4x768xf32, #tpu.memory_space<vmem>>, vector<1x4x768xf32>,
    %c0_60 = arith.constant 0 : index
    %c0_61 = arith.constant 0 : index
    %c0_62 = arith.constant 0 : index
    %81 = vector.load %arg5[%c0_60, %c0_61, %c0_62] : memref<1x4x768xf32, #tpu.memory_space<vmem>>, vector<1x4x768xf32>
    %82 = vector.shape_cast %81 : vector<1x4x768xf32> to vector<4x768xf32>
    %83 = vector.broadcast %0 : vector<1x768xf32> to vector<4x768xf32>
    %84 = arith.mulf %82, %83 : vector<4x768xf32>
    %cst_63 = arith.constant dense<0.000000e+00> : vector<4xf32>
    %85 = vector.multi_reduction <add>, %84, %cst_63 [1] : vector<4x768xf32> to vector<4xf32>
    %86 = vector.shape_cast %85 : vector<4xf32> to vector<4x1xf32>
    %87 = arith.mulf %84, %82 : vector<4x768xf32>
    %cst_64 = arith.constant dense<0.000000e+00> : vector<4xf32>
    %88 = vector.multi_reduction <add>, %87, %cst_64 [1] : vector<4x768xf32> to vector<4xf32>
    %89 = vector.shape_cast %88 : vector<4xf32> to vector<4x1xf32>
    %cst_65 = arith.constant dense<0.000000e+00> : vector<1xf32>
    %90 = vector.multi_reduction <add>, %86, %cst_65 [0] : vector<4x1xf32> to vector<1xf32>
    %91 = vector.shape_cast %90 : vector<1xf32> to vector<1x1xf32>
    %cst_66 = arith.constant 4.8828125E-4 : f32
    %92 = vector.broadcast %cst_66 : f32 to vector<1x1xf32>
    %93 = arith.mulf %91, %92 : vector<1x1xf32>
    %cst_67 = arith.constant dense<0.000000e+00> : vector<1xf32>
    %94 = vector.multi_reduction <add>, %89, %cst_67 [0] : vector<4x1xf32> to vector<1xf32>
    %95 = vector.shape_cast %94 : vector<1xf32> to vector<1x1xf32>
    %cst_68 = arith.constant 4.8828125E-4 : f32
    %96 = vector.broadcast %cst_68 : f32 to vector<1x1xf32>
    %97 = arith.mulf %95, %96 : vector<1x1xf32>
    %98 = arith.mulf %93, %93 : vector<1x1xf32>
    %99 = arith.subf %97, %98 : vector<1x1xf32>
    %cst_69 = arith.constant 0.000000e+00 : f32
    %100 = vector.broadcast %cst_69 : f32 to vector<1x1xf32>
    %101 = arith.maximumf %99, %100 : vector<1x1xf32>
    %102 = vector.extract_strided_slice %63 {offsets = [0, 2], sizes = [4, 1], strides = [1, 1]} : vector<4x4xf32> to vector<4x1xf32>
    %cst_70 = arith.constant 9.99999974E-6 : f32
    %103 = vector.broadcast %cst_70 : f32 to vector<1x1xf32>
    %104 = arith.addf %101, %103 : vector<1x1xf32>
    %105 = math.rsqrt %104 : vector<1x1xf32>
    %106 = vector.broadcast %105 : vector<1x1xf32> to vector<4x1xf32>
    %107 = arith.mulf %102, %106 : vector<4x1xf32>
    %108 = vector.extract_strided_slice %63 {offsets = [0, 3], sizes = [4, 1], strides = [1, 1]} : vector<4x4xf32> to vector<4x1xf32>
    %109 = vector.broadcast %93 : vector<1x1xf32> to vector<4x1xf32>
    %110 = arith.mulf %109, %107 : vector<4x1xf32>
    %111 = arith.subf %108, %110 : vector<4x1xf32>
    %112 = vector.broadcast %107 : vector<4x1xf32> to vector<4x768xf32>
    %113 = arith.mulf %82, %112 : vector<4x768xf32>
    %114 = vector.broadcast %111 : vector<4x1xf32> to vector<4x768xf32>
    %115 = arith.addf %113, %114 : vector<4x768xf32>
    %cst_71 = arith.constant 0.000000e+00 : f32
    %116 = vector.broadcast %cst_71 : f32 to vector<4x768xf32>
    %117 = arith.maximumf %115, %116 : vector<4x768xf32>
    %c0_72 = arith.constant 0 : index
    %c0_73 = arith.constant 0 : index
    %c0_74 = arith.constant 0 : index
    %118 = vector.load %arg5[%c0_72, %c0_73, %c0_74] : memref<1x4x768xf32, #tpu.memory_space<vmem>>, vector<1x4x768xf32>
    %119 = vector.shape_cast %118 : vector<1x4x768xf32> to vector<4x768xf32>
    %120 = vector.shape_cast %117 : vector<4x768xf32> to vector<1x4x768xf32>
    tpu.vector_store %arg5[%c0_72, %c0_73, %c0_74], %120 {strides = array<i32>} : memref<1x4x768xf32, #tpu.memory_space<vmem>>, vector<1x4x768xf32>,
    return
  }
  func.func @transform_0(%arg0: i32) -> (i32, i32) {
    %c0_i32 = arith.constant 0 : i32
    %c0_i32_0 = arith.constant 0 : i32
    %c0_i32_1 = arith.constant 0 : i32
    return %c0_i32, %c0_i32_0 : i32, i32
  }
  func.func @transform_1(%arg0: i32) -> (i32, i32) {
    %c0_i32 = arith.constant 0 : i32
    %c0_i32_0 = arith.constant 0 : i32
    %c0_i32_1 = arith.constant 0 : i32
    return %c0_i32, %c0_i32_0 : i32, i32
  }
  func.func @transform_2(%arg0: i32) -> (i32, i32, i32, i32) {
    %c0_i32 = arith.constant 0 : i32
    %c0_i32_0 = arith.constant 0 : i32
    %c0_i32_1 = arith.constant 0 : i32
    %c0_i32_2 = arith.constant 0 : i32
    return %arg0, %c0_i32, %c0_i32_0, %c0_i32_1 : i32, i32, i32, i32
  }
  func.func @transform_3(%arg0: i32) -> (i32, i32, i32) {
    %c0_i32 = arith.constant 0 : i32
    %c0_i32_0 = arith.constant 0 : i32
    %c0_i32_1 = arith.constant 0 : i32
    return %arg0, %c0_i32, %c0_i32_0 : i32, i32, i32
  }
  func.func @transform_4(%arg0: i32) -> (i32, i32, i32) {
    %c0_i32 = arith.constant 0 : i32
    %c0_i32_0 = arith.constant 0 : i32
    %c0_i32_1 = arith.constant 0 : i32
    return %arg0, %c0_i32, %c0_i32_0 : i32, i32, i32
  }
}

</mosaic_0001>

<bundles_post_ra>
// kernel: decoder_block_forward.1
= control target key start
LH: loop header
LB: loop body
LE: loop exit
PB: predicated region body
PF: predicated region fallthrough
CT: control target
= control target key end

     0   :  { %s3085_s15 = smov 0   ;;  %s3475_s0 = inlined_call_operand.vmem [shape: f32[4,1024], index: 0, kind: input, shape index: {}]   ;;  %s3476_s1 = inlined_call_operand.vmem [shape: f32[1,768], index: 1, kind: input, shape index: {}]   ;;  %s3477_s2 = inlined_call_operand.vmem [shape: f32[4,9,4,4], index: 2, kind: input, shape index: {}]   ;;  %s3478_s3 = inlined_call_operand.vmem [shape: f32[4,4,4], index: 3, kind: input, shape index: {}]   ;;  %s3479_s4 = inlined_call_operand.vmem [shape: f32[4,4,768], index: 4, kind: output, shape index: {}]  }
   0x1 LB: > { %s2900_s16 = sadd.s32 4294967295, %s3044_s15   ;;  %p2904_p0 = scmp.ge.s32.totalorder %s3044_s15, 1  ;;  %s3044_s15 = sphi %s3085_s15, %s14_s15  }
   0x2   : > { %p171_p1 = scmp.lt.s32.totalorder %s3044_s15, 5 }
   0x4   : > { %p172_p2 = pnand %p2904_p0, %p171_p1 }
   0x5   : > { %s3046_s21 = smov (!%p172_p2), 18   ;;  %s3048_s26 = smov (!%p172_p2), 19  }
   0x6   : > { %175 = sbr.rel (%p172_p2) target bundleno = 1299 (0x513), region = 36  ;;  %s3049_s27 = smov (!%p172_p2), 17  }
   0x7   : > { %s3050_s30 = smov (!%p172_p2), 1   ;;  %s3051_s11 = smov (!%p172_p2), 127  }
   0x8   : > { %s3052_s18 = smov (!%p172_p2), 111   ;;  %s3054_s24 = smov (!%p172_p2), 109  }
   0x9   : > { %p201_p3 = scmp.lt.s32.totalorder (!%p172_p2), %s2900_s16, 3 }
   0xb   : > { %v216_v0 = vld [vmem:[%s3475_s0] sm:$0xff]  ;;  %v217_v1 = vld [vmem:[%s3475_s0 + $0x8] sm:$0xff]  ;;  %v218_v4 = vld [vmem:[%s3475_s0 + $0x10] sm:$0xff]  ;;  %v3047_v6 = vmov 0.0   ;;  %s3481_s16 = smov (!%p201_p3, %s2900_s16), 3  ;;  %vm244_vm0 = vcmask 146432  }
   0xc   : > { %230 = vrot.lane.b32.xlu1 %v216_v0, %s3046_s21  ;;  %v227_v2 = vcombine.high %v216_v0, %v216_v0  ;;  %v228_v3 = vcombine.high %v217_v1, %v217_v1  ;;  %v229_v5 = vcombine.high %v218_v4, %v218_v4  ;;  %332 = vmatprep.mubr.f32.mxu0 %v3047_v6  ;;  %v219_v7 = vld [vmem:[%s3475_s0 + $0x18] sm:$0xf]  ;;  %v3121_v10 = vld [vmem:[%s3475_s0 + $0x4] sm:$0xff]  ;;  %v3127_v11 = vld [vmem:[%s3475_s0 + $0xc] sm:$0xff]  ;;  %vm255_vm1 = vcmask 1043456   ;;  %s2906_s8 = sshll.u32 %s3481_s16, 2 }
   0xd   : > { %403 = vmatprep.mubr.f32.mxu1 %v3047_v6  ;;  %v733_v8 = vld [vmem:[%s3475_s0 + $0x18] sm:$0xf]  ;;  %v3132_v12 = vcombine.high %v3121_v10, %v3121_v10  ;;  %v3142_v14 = vcombine.high %v3127_v11, %v3127_v11  ;;  %v1514_v16 = vld [vmem:[%s3475_s0 + $0x1c] sm:$0xf]  ;;  %vm251_vm2 = vcmask 31744   ;;  %vm495_vm3 = vcmask 154624  }
   0xe   : > { %232 = vrot.lane.b32.xlu0 %v227_v2, %s3046_s21  ;;  %v1001_v9 = vld [vmem:[%s3475_s0 + $0x18] sm:$0xf]  ;;  %v1782_v17 = vld [vmem:[%s3475_s0 + $0x1c] sm:$0xf]  ;;  %vm757_vm4 = vcmask 138240   ;;  %vm1025_vm5 = vcmask 7168  }
   0xf   : > { %v3138_v13 = vld [vmem:[%s3475_s0 + $0x14] sm:$0xff]  ;;  %v2050_v18 = vld [vmem:[%s3475_s0 + $0x1c] sm:$0xf]  ;;  %vm1538_vm6 = vcmask 1039360   ;;  %vm1806_vm7 = vcmask 908288   ;;  %vm2074_vm8 = vcmask 900096  }
  0x10   : > { %236 = vrot.lane.b32.xlu1 %v228_v3, %s3046_s21  ;;  %v3147_v15 = vcombine.high %v3138_v13, %v3138_v13  ;;  %v2318_v19 = vld [vmem:[%s3475_s0 + $0x1c] sm:$0xf]  ;;  %vm2342_vm9 = vcmask 891904   ;;  %s3000_s12 = smul.u32 24, %s3481_s16 }
  0x12   : > { %234 = vrot.lane.b32.xlu0 %v217_v1, %s3046_s21  ;;  %s214_s14 = scalar_lea.vmem %s3479_s4, %s3000_s12 }
  0x14   : > { %240 = vrot.lane.b32.xlu1 %v229_v5, %s3046_s21 }
  0x16   : > { %238 = vrot.lane.b32.xlu0 %v218_v4, %s3046_s21 }
  0x18   : > { %483 = vrot.lane.b32.xlu1 %v227_v2, %s3048_s26 }
  0x1a   : > { %242 = vrot.lane.b32.xlu0 %v219_v7, %s3046_s21  ;;  %s3053_s21 = smov 110  }
  0x1c   : > { %487 = vrot.lane.b32.xlu1 %v228_v3, %s3048_s26 }
  0x1e   : > { %485 = vrot.lane.b32.xlu0 %v217_v1, %s3048_s26 }
  0x20   : > { %481 = vrot.lane.b32.xlu1 %v216_v0, %s3048_s26 }
  0x22   : > { %489 = vrot.lane.b32.xlu0 %v218_v4, %s3048_s26 }
  0x24   : > { %493 = vrot.lane.b32.xlu1 %v219_v7, %s3048_s26 }
  0x26   : > { %491 = vrot.lane.b32.xlu0 %v229_v5, %s3048_s26 }
  0x28   : > { %747 = vrot.lane.b32.xlu1 %v217_v1, %s3049_s27 }
  0x2a   : > { %745 = vrot.lane.b32.xlu0 %v227_v2, %s3049_s27 }
  0x2c   : > { %749 = vrot.lane.b32.xlu1 %v228_v3, %s3049_s27 }
  0x2e   : > { %743 = vrot.lane.b32.xlu0 %v216_v0, %s3049_s27 }
  0x30   : > { %753 = vrot.lane.b32.xlu1 %v229_v5, %s3049_s27 }
  0x32   : > { %751 = vrot.lane.b32.xlu0 %v218_v4, %s3049_s27 }
  0x34   : > { %1013 = vrot.lane.b32.xlu1 %v227_v2, %s3050_s30 }
  0x36   : > { %755 = vrot.lane.b32.xlu0 %v733_v8, %s3049_s27  ;;  %s2999_s27 = smul.u32 36, %s3481_s16 }
  0x38   : > { %1017 = vrot.lane.b32.xlu1 %v228_v3, %s3050_s30  ;;  %s3193_s5 = scalar_lea.vmem %s3477_s2, %s2999_s27 }
  0x39   : > { %v2908_v25 = vld [vmem:[%s3193_s5 + $0x4] sm:$0xf]  ;;  %v220_v39 = vld [vmem:[%s3193_s5] sm:$0xf]  ;;  %v2927_v53 = vld [vmem:[%s3193_s5 + $0x8] sm:$0xf] }
  0x3a   : > { %1015 = vrot.lane.b32.xlu0 %v217_v1, %s3050_s30  ;;  %v2937_v3 = vld [vmem:[%s3193_s5 + $0xc] sm:$0xf] }
  0x3c   : > { %1011 = vrot.lane.b32.xlu1 %v216_v0, %s3050_s30 }
  0x3e   : > { %1019 = vrot.lane.b32.xlu0 %v218_v4, %s3050_s30 }
  0x40   : > { %1023 = vrot.lane.b32.xlu1 %v1001_v9, %s3050_s30 }
  0x42   : > { %1021 = vrot.lane.b32.xlu0 %v229_v5, %s3050_s30 }
  0x44   : > { %1528 = vrot.lane.b32.xlu1 %v3127_v11, %s3051_s11 }
  0x46   : > { %1526 = vrot.lane.b32.xlu0 %v3132_v12, %s3051_s11 }
  0x48   : > { %1532 = vrot.lane.b32.xlu1 %v3138_v13, %s3051_s11 }
  0x4a   : > { %1530 = vrot.lane.b32.xlu0 %v3142_v14, %s3051_s11 }
  0x4c   : > { %1534 = vrot.lane.b32.xlu1 %v3147_v15, %s3051_s11 }
  0x4e   : > { %1524 = vrot.lane.b32.xlu0 %v3121_v10, %s3051_s11 }
  0x50   : > { %1794 = vrot.lane.b32.xlu1 %v3132_v12, %s3052_s18 }
  0x52   : > { %1536 = vrot.lane.b32.xlu0 %v1514_v16, %s3051_s11  ;;  %s209_s11 = scalar_lea.vmem %s3478_s3, %s2906_s8 }
  0x54   : > { %1792 = vrot.lane.b32.xlu1 %v3121_v10, %s3052_s18 }
  0x56   : > { %1796 = vrot.lane.b32.xlu0 %v3127_v11, %s3052_s18 }
  0x58   : > { %1800 = vrot.lane.b32.xlu1 %v3138_v13, %s3052_s18 }
  0x5a   : > { %1798 = vrot.lane.b32.xlu0 %v3142_v14, %s3052_s18 }
  0x5c   : > { %1804 = vrot.lane.b32.xlu1 %v1782_v17, %s3052_s18 }
  0x5e   : > { %1802 = vrot.lane.b32.xlu0 %v3147_v15, %s3052_s18 }
  0x60   : > { %2064 = vrot.lane.b32.xlu1 %v3127_v11, %s3053_s21 }
  0x62   : > { %2062 = vrot.lane.b32.xlu0 %v3132_v12, %s3053_s21 }
  0x64   : > { %2068 = vrot.lane.b32.xlu1 %v3138_v13, %s3053_s21 }
  0x66   : > { %2066 = vrot.lane.b32.xlu0 %v3142_v14, %s3053_s21 }
  0x68   : > { %2070 = vrot.lane.b32.xlu1 %v3147_v15, %s3053_s21 }
  0x6a   : > { %2060 = vrot.lane.b32.xlu0 %v3121_v10, %s3053_s21 }
  0x6c   : > { %2330 = vrot.lane.b32.xlu1 %v3132_v12, %s3054_s24 }
  0x6e   : > { %2072 = vrot.lane.b32.xlu0 %v2050_v18, %s3053_s21 }
  0x70   : > { %2328 = vrot.lane.b32.xlu1 %v3121_v10, %s3054_s24 }
  0x72   : > { %2332 = vrot.lane.b32.xlu0 %v3127_v11, %s3054_s24 }
  0x74   : > { %2336 = vrot.lane.b32.xlu1 %v3138_v13, %s3054_s24 }
  0x76   : > { %2334 = vrot.lane.b32.xlu0 %v3142_v14, %s3054_s24 }
  0x78   : > { %2340 = vrot.lane.b32.xlu1 %v2318_v19, %s3054_s24 }
  0x7a   : > { %2338 = vrot.lane.b32.xlu0 %v3147_v15, %s3054_s24 }
  0x7e   : > { %v231_v20 = vpop.permute.xlu1 %230 }
  0x80   : > { %v233_v21 = vpop.permute.xlu0 %232 }
  0x81   : > { %v245_v27 = vsel %vm244_vm0, %v231_v20, %v233_v21  ;;  %v2947_v20 = vld [vmem:[%s3193_s5 + $0x10] sm:$0xf] }
  0x82   : > { %v237_v22 = vpop.permute.xlu1 %236 }
  0x84   : > { %v235_v23 = vpop.permute.xlu0 %234 }
  0x85   : > { %v246_v24 = vsel %vm244_vm0, %v233_v21, %v235_v23  ;;  %v247_v31 = vsel %vm244_vm0, %v235_v23, %v237_v22  ;;  %v2957_v23 = vld [vmem:[%s3193_s5 + $0x14] sm:$0xf] }
  0x86   : > { %v241_v26 = vpop.permute.xlu1 %240  ;;  %2909 = vmatprep.subr.msk.mxu0 %vm255_vm1, %v246_v24 }
  0x87   : > { %2910 = vmatpush1.msk.msra.mxu0 %vm255_vm1, %v245_v27 }
  0x88   : > { %v239_v28 = vpop.permute.xlu0 %238  ;;  %2911 = vmatmul.mubr.msk.f32.vlgmr.msra.gmra.mxu0 %vm251_vm2, %v2908_v25 }
  0x89   : > { %v248_v29 = vsel %vm244_vm0, %v237_v22, %v239_v28  ;;  %474 = vmatprep.mubr.f32.mxu0 %v3047_v6  ;;  %v249_v34 = vsel %vm244_vm0, %v239_v28, %v241_v26 }
  0x8a   : > { %v484_v30 = vpop.permute.xlu1 %483  ;;  %2912 = vmatprep.subr.msk.mxu1 %vm255_vm1, %v248_v29 }
  0x8b   : > { %2913 = vmatpush1.msk.msra.mxu1 %vm255_vm1, %v247_v31 }
  0x8c   : > { %v243_v32 = vpop.permute.xlu0 %242  ;;  %2914 = vmatmul.mubr.msk.f32.vlgmr.msra.gmra.mxu1 %vm251_vm2, %v2908_v25 }
  0x8d   : > { %v250_v33 = vsel %vm244_vm0, %v241_v26, %v243_v32  ;;  %581 = vmatprep.mubr.f32.mxu1 %v3047_v6  ;;  %v2967_v32 = vld [vmem:[%s3193_s5 + $0x18] sm:$0xf] }
  0x8e   : > { %v488_v35 = vpop.permute.xlu1 %487  ;;  %2915 = vmatprep.subr.msk.mxu0 %vm255_vm1, %v250_v33 }
  0x8f   : > { %2916 = vmatpush1.msk.msra.mxu0 %vm255_vm1, %v249_v34 }
  0x90   : > { %v486_v36 = vpop.permute.xlu0 %485  ;;  %2917 = vmatmul.mubr.msk.f32.vlgmr.msra.gmra.mxu0 %vm251_vm2, %v2908_v25 }
  0x91   : > { %v497_v37 = vsel %vm495_vm3, %v484_v30, %v486_v36  ;;  %652 = vmatprep.mubr.f32.mxu0 %v3047_v6  ;;  %v498_v43 = vsel %vm495_vm3, %v486_v36, %v488_v35 }
  0x92   : > { %v482_v38 = vpop.permute.xlu1 %481  ;;  %2918 = vmatprep.subr.msk.mxu1 %vm255_vm1, %v497_v37 }
  0x93   : > { %v496_v40 = vsel %vm495_vm3, %v482_v38, %v484_v30 }
  0x94   : > { %v490_v41 = vpop.permute.xlu0 %489  ;;  %2919 = vmatpush1.msk.msra.mxu1 %vm255_vm1, %v496_v40 }
  0x95   : > { %v499_v42 = vsel %vm495_vm3, %v488_v35, %v490_v41  ;;  %2920 = vmatmul.mubr.msk.f32.vlgmr.msra.gmra.mxu1 %vm251_vm2, %v220_v39 }
  0x96   : > { %v494_v44 = vpop.permute.xlu1 %493  ;;  %2921 = vmatprep.subr.msk.mxu0 %vm255_vm1, %v499_v42  ;;  %723 = vmatprep.mubr.f32.mxu1 %v3047_v6 }
  0x97   : > { %2922 = vmatpush1.msk.msra.mxu0 %vm255_vm1, %v498_v43 }
  0x98   : > { %v492_v45 = vpop.permute.xlu0 %491  ;;  %2923 = vmatmul.mubr.msk.f32.vlgmr.msra.gmra.mxu0 %vm251_vm2, %v220_v39 }
  0x99   : > { %v500_v46 = vsel %vm495_vm3, %v490_v41, %v492_v45  ;;  %v501_v47 = vsel %vm495_vm3, %v492_v45, %v494_v44  ;;  %843 = vmatprep.mubr.f32.mxu0 %v3047_v6 }
  0x9a   : > { %v748_v48 = vpop.permute.xlu1 %747  ;;  %2924 = vmatprep.subr.msk.mxu1 %vm255_vm1, %v501_v47 }
  0x9b   : > { %2925 = vmatpush1.msk.msra.mxu1 %vm255_vm1, %v500_v46 }
  0x9c   : > { %v746_v49 = vpop.permute.xlu0 %745  ;;  %2926 = vmatmul.mubr.msk.f32.vlgmr.msra.gmra.mxu1 %vm251_vm2, %v220_v39 }
  0x9d   : > { %v759_v50 = vsel %vm757_vm4, %v746_v49, %v748_v48  ;;  %914 = vmatprep.mubr.f32.mxu1 %v3047_v6 }
  0x9e   : > { %v750_v51 = vpop.permute.xlu1 %749  ;;  %2928 = vmatprep.subr.msk.mxu0 %vm255_vm1, %v759_v50 }
  0x9f   : > { %v760_v58 = vsel %vm757_vm4, %v748_v48, %v750_v51 }
  0xa0   : > { %v744_v52 = vpop.permute.xlu0 %743 }
  0xa1   : > { %v758_v54 = vsel %vm757_vm4, %v744_v52, %v746_v49  ;;  %v2977_v49 = vld [vmem:[%s3193_s5 + $0x1c] sm:$0xf] }
  0xa2   : > { %v754_v55 = vpop.permute.xlu1 %753  ;;  %2929 = vmatpush1.msk.msra.mxu0 %vm255_vm1, %v758_v54 }
  0xa3   : > { %2930 = vmatmul.mubr.msk.f32.vlgmr.msra.gmra.mxu0 %vm251_vm2, %v2927_v53 }
  0xa4   : > { %v752_v56 = vpop.permute.xlu0 %751  ;;  %985 = vmatprep.mubr.f32.mxu0 %v3047_v6 }
  0xa5   : > { %v761_v57 = vsel %vm757_vm4, %v750_v51, %v752_v56  ;;  %v762_v62 = vsel %vm757_vm4, %v752_v56, %v754_v55 }
  0xa6   : > { %v1014_v59 = vpop.permute.xlu1 %1013  ;;  %2931 = vmatprep.subr.msk.mxu1 %vm255_vm1, %v761_v57 }
  0xa7   : > { %2932 = vmatpush1.msk.msra.mxu1 %vm255_vm1, %v760_v58 }
  0xa8   : > { %v756_v60 = vpop.permute.xlu0 %755  ;;  %2933 = vmatmul.mubr.msk.f32.vlgmr.msra.gmra.mxu1 %vm251_vm2, %v2927_v53 }
  0xa9   : > { %v763_v61 = vsel %vm757_vm4, %v754_v55, %v756_v60  ;;  %1111 = vmatprep.mubr.f32.mxu1 %v3047_v6  ;;  %v2987_v60 = vld [vmem:[%s3193_s5 + $0x20] sm:$0xf] }
  0xaa   : > { %v1018_v63 = vpop.permute.xlu1 %1017  ;;  %2934 = vmatprep.subr.msk.mxu0 %vm255_vm1, %v763_v61 }
  0xab   : > { %2935 = vmatpush1.msk.msra.mxu0 %vm255_vm1, %v762_v62 }
  0xac   : > { %v1016_v0 = vpop.permute.xlu0 %1015  ;;  %2936 = vmatmul.mubr.msk.f32.vlgmr.msra.gmra.mxu0 %vm251_vm2, %v2927_v53 }
  0xad   : > { %v1027_v1 = vsel %vm1025_vm5, %v1014_v59, %v1016_v0  ;;  %1182 = vmatprep.mubr.f32.mxu0 %v3047_v6  ;;  %v1028_v8 = vsel %vm1025_vm5, %v1016_v0, %v1018_v63 }
  0xae   : > { %v1012_v2 = vpop.permute.xlu1 %1011  ;;  %2938 = vmatprep.subr.msk.mxu1 %vm255_vm1, %v1027_v1 }
  0xaf   : > { %v1026_v4 = vsel %vm1025_vm5, %v1012_v2, %v1014_v59 }
  0xb0   : > { %v1020_v5 = vpop.permute.xlu0 %1019  ;;  %2939 = vmatpush1.msk.msra.mxu1 %vm255_vm1, %v1026_v4 }
  0xb1   : > { %v1029_v7 = vsel %vm1025_vm5, %v1018_v63, %v1020_v5  ;;  %2940 = vmatmul.mubr.msk.f32.vlgmr.msra.gmra.mxu1 %vm251_vm2, %v2937_v3 }
  0xb2   : > { %v1024_v9 = vpop.permute.xlu1 %1023  ;;  %2941 = vmatprep.subr.msk.mxu0 %vm255_vm1, %v1029_v7  ;;  %1253 = vmatprep.mubr.f32.mxu1 %v3047_v6 }
  0xb3   : > { %2942 = vmatpush1.msk.msra.mxu0 %vm255_vm1, %v1028_v8 }
  0xb4   : > { %v1022_v16 = vpop.permute.xlu0 %1021  ;;  %2943 = vmatmul.mubr.msk.f32.vlgmr.msra.gmra.mxu0 %vm251_vm2, %v2937_v3  ;;  %2948 = vmatprep.subr.msk.mxu0 %vm255_vm1, %v3132_v12 }
  0xb5   : > { %v1030_v17 = vsel %vm1025_vm5, %v1020_v5, %v1022_v16  ;;  %v1031_v18 = vsel %vm1025_vm5, %v1022_v16, %v1024_v9  ;;  %2949 = vmatpush1.msk.msra.mxu0 %vm255_vm1, %v3121_v10  ;;  %1356 = vmatprep.mubr.f32.mxu0 %v3047_v6 }
  0xb6   : > { %v1529_v19 = vpop.permute.xlu1 %1528  ;;  %2944 = vmatprep.subr.msk.mxu1 %vm255_vm1, %v1031_v18  ;;  %2954 = vmatprep.subr.msk.mxu0 %vm255_vm1, %v3147_v15 }
  0xb7   : > { %2945 = vmatpush1.msk.msra.mxu1 %vm255_vm1, %v1030_v17 }
  0xb8   : > { %v1527_v12 = vpop.permute.xlu0 %1526  ;;  %2951 = vmatprep.subr.msk.mxu1 %vm255_vm1, %v3142_v14  ;;  %2946 = vmatmul.mubr.msk.f32.vlgmr.msra.gmra.mxu1 %vm251_vm2, %v2937_v3 }
  0xb9   : > { %v1540_v10 = vsel %vm1538_vm6, %v1527_v12, %v1529_v19  ;;  %2952 = vmatpush1.msk.msra.mxu1 %vm255_vm1, %v3127_v11  ;;  %2950 = vmatmul.mubr.msk.f32.vlgmr.msra.gmra.mxu0 %vm251_vm2, %v2947_v20 }
  0xba   : > { %v1533_v21 = vpop.permute.xlu1 %1532  ;;  %2958 = vmatprep.subr.msk.mxu1 %vm255_vm1, %v1540_v10  ;;  %2955 = vmatpush1.msk.msra.mxu0 %vm255_vm1, %v3138_v13 }
  0xbb   : > { %1427 = vmatprep.mubr.f32.mxu1 %v3047_v6  ;;  %1498 = vmatprep.mubr.f32.mxu0 %v3047_v6 }
  0xbc   : > { %v1531_v14 = vpop.permute.xlu0 %1530  ;;  %2953 = vmatmul.mubr.msk.f32.vlgmr.msra.gmra.mxu1 %vm251_vm2, %v2947_v20 }
  0xbd   : > { %v1541_v15 = vsel %vm1538_vm6, %v1529_v19, %v1531_v14  ;;  %v1542_v22 = vsel %vm1538_vm6, %v1531_v14, %v1533_v21  ;;  %2956 = vmatmul.mubr.msk.f32.vlgmr.msra.gmra.mxu0 %vm251_vm2, %v2947_v20  ;;  %1624 = vmatprep.mubr.f32.mxu1 %v3047_v6 }
  0xbe   : > { %v1535_v11 = vpop.permute.xlu1 %1534  ;;  %2961 = vmatprep.subr.msk.mxu0 %vm255_vm1, %v1542_v22  ;;  %1695 = vmatprep.mubr.f32.mxu0 %v3047_v6 }
  0xbf   : > { %2962 = vmatpush1.msk.msra.mxu0 %vm255_vm1, %v1541_v15  ;;  %v1543_v28 = vsel %vm1538_vm6, %v1533_v21, %v1535_v11 }
  0xc0   : > { %v1525_v13 = vpop.permute.xlu0 %1524 }
  0xc1   : > { %v1539_v24 = vsel %vm1538_vm6, %v1525_v13, %v1527_v12  ;;  %2963 = vmatmul.mubr.msk.f32.vlgmr.msra.gmra.mxu0 %vm251_vm2, %v2957_v23 }
  0xc2   : > { %v1795_v25 = vpop.permute.xlu1 %1794  ;;  %2959 = vmatpush1.msk.msra.mxu1 %vm255_vm1, %v1539_v24  ;;  %1892 = vmatprep.mubr.f32.mxu0 %v3047_v6 }
  0xc3   : > { %2960 = vmatmul.mubr.msk.f32.vlgmr.msra.gmra.mxu1 %vm251_vm2, %v2957_v23 }
  0xc4   : > { %v1537_v26 = vpop.permute.xlu0 %1536  ;;  %1766 = vmatprep.mubr.f32.mxu1 %v3047_v6 }
  0xc5   : > { %v1544_v27 = vsel %vm1538_vm6, %v1535_v11, %v1537_v26 }
  0xc6   : > { %v1793_v29 = vpop.permute.xlu1 %1792  ;;  %2964 = vmatprep.subr.msk.mxu1 %vm255_vm1, %v1544_v27 }
  0xc7   : > { %2965 = vmatpush1.msk.msra.mxu1 %vm255_vm1, %v1543_v28  ;;  %v1807_v33 = vsel %vm1806_vm7, %v1793_v29, %v1795_v25 }
  0xc8   : > { %v1797_v30 = vpop.permute.xlu0 %1796  ;;  %2966 = vmatmul.mubr.msk.f32.vlgmr.msra.gmra.mxu1 %vm251_vm2, %v2957_v23 }
  0xc9   : > { %v1808_v31 = vsel %vm1806_vm7, %v1795_v25, %v1797_v30  ;;  %1963 = vmatprep.mubr.f32.mxu1 %v3047_v6 }
  0xca   : > { %v1801_v34 = vpop.permute.xlu1 %1800  ;;  %2968 = vmatprep.subr.msk.mxu0 %vm255_vm1, %v1808_v31 }
  0xcb   : > { %2969 = vmatpush1.msk.msra.mxu0 %vm255_vm1, %v1807_v33 }
  0xcc   : > { %v1799_v35 = vpop.permute.xlu0 %1798  ;;  %2970 = vmatmul.mubr.msk.f32.vlgmr.msra.gmra.mxu0 %vm251_vm2, %v2967_v32 }
  0xcd   : > { %v1809_v36 = vsel %vm1806_vm7, %v1797_v30, %v1799_v35  ;;  %v1810_v37 = vsel %vm1806_vm7, %v1799_v35, %v1801_v34  ;;  %2034 = vmatprep.mubr.f32.mxu0 %v3047_v6 }
  0xce   : > { %v1805_v38 = vpop.permute.xlu1 %1804  ;;  %2971 = vmatprep.subr.msk.mxu1 %vm255_vm1, %v1810_v37 }
  0xcf   : > { %2972 = vmatpush1.msk.msra.mxu1 %vm255_vm1, %v1809_v36 }
  0xd0   : > { %v1803_v39 = vpop.permute.xlu0 %1802  ;;  %2973 = vmatmul.mubr.msk.f32.vlgmr.msra.gmra.mxu1 %vm251_vm2, %v2967_v32 }
  0xd1   : > { %v1811_v40 = vsel %vm1806_vm7, %v1801_v34, %v1803_v39  ;;  %v1812_v41 = vsel %vm1806_vm7, %v1803_v39, %v1805_v38  ;;  %2160 = vmatprep.mubr.f32.mxu1 %v3047_v6 }
  0xd2   : > { %v2065_v42 = vpop.permute.xlu1 %2064  ;;  %2974 = vmatprep.subr.msk.mxu0 %vm255_vm1, %v1812_v41 }
  0xd3   : > { %2975 = vmatpush1.msk.msra.mxu0 %vm255_vm1, %v1811_v40 }
  0xd4   : > { %v2063_v43 = vpop.permute.xlu0 %2062  ;;  %2976 = vmatmul.mubr.msk.f32.vlgmr.msra.gmra.mxu0 %vm251_vm2, %v2967_v32 }
  0xd5   : > { %v2076_v44 = vsel %vm2074_vm8, %v2063_v43, %v2065_v42  ;;  %2231 = vmatprep.mubr.f32.mxu0 %v3047_v6 }
  0xd6   : > { %v2069_v45 = vpop.permute.xlu1 %2068  ;;  %2978 = vmatprep.subr.msk.mxu1 %vm255_vm1, %v2076_v44 }
  0xd8   : > { %v2067_v46 = vpop.permute.xlu0 %2066 }
  0xd9   : > { %v2077_v47 = vsel %vm2074_vm8, %v2065_v42, %v2067_v46  ;;  %v2078_v48 = vsel %vm2074_vm8, %v2067_v46, %v2069_v45 }
  0xda   : > { %v2071_v50 = vpop.permute.xlu1 %2070  ;;  %2981 = vmatprep.subr.msk.mxu0 %vm255_vm1, %v2078_v48 }
  0xdb   : > { %2982 = vmatpush1.msk.msra.mxu0 %vm255_vm1, %v2077_v47  ;;  %v2079_v56 = vsel %vm2074_vm8, %v2069_v45, %v2071_v50 }
  0xdc   : > { %v2061_v51 = vpop.permute.xlu0 %2060  ;;  %2983 = vmatmul.mubr.msk.f32.vlgmr.msra.gmra.mxu0 %vm251_vm2, %v2977_v49 }
  0xdd   : > { %v2075_v52 = vsel %vm2074_vm8, %v2061_v51, %v2063_v43  ;;  %2428 = vmatprep.mubr.f32.mxu0 %v3047_v6 }
  0xde   : > { %v2331_v53 = vpop.permute.xlu1 %2330  ;;  %2979 = vmatpush1.msk.msra.mxu1 %vm255_vm1, %v2075_v52 }
  0xdf   : > { %2980 = vmatmul.mubr.msk.f32.vlgmr.msra.gmra.mxu1 %vm251_vm2, %v2977_v49 }
  0xe0   : > { %v2073_v54 = vpop.permute.xlu0 %2072  ;;  %2302 = vmatprep.mubr.f32.mxu1 %v3047_v6 }
  0xe1   : > { %v2080_v55 = vsel %vm2074_vm8, %v2071_v50, %v2073_v54  ;;  %v2584_v50 = vlaneseq }
  0xe2   : > { %v2329_v57 = vpop.permute.xlu1 %2328  ;;  %2984 = vmatprep.subr.msk.mxu1 %vm255_vm1, %v2080_v55 }
  0xe3   : > { %2985 = vmatpush1.msk.msra.mxu1 %vm255_vm1, %v2079_v56  ;;  %v2343_v61 = vsel %vm2342_vm9, %v2329_v57, %v2331_v53 }
  0xe4   : > { %v2333_v58 = vpop.permute.xlu0 %2332  ;;  %2986 = vmatmul.mubr.msk.f32.vlgmr.msra.gmra.mxu1 %vm251_vm2, %v2977_v49 }
  0xe5   : > { %v2344_v59 = vsel %vm2342_vm9, %v2331_v53, %v2333_v58  ;;  %2499 = vmatprep.mubr.f32.mxu1 %v3047_v6 }
  0xe6   : > { %2988 = vmatprep.subr.msk.mxu0 %vm255_vm1, %v2344_v59  ;;  %v2337_v62 = vpop.permute.xlu1 %2336  ;;  %v3364_v59 = vshrl.u32 %v2584_v50, 7 }
  0xe7   : > { %2989 = vmatpush1.msk.msra.mxu0 %vm255_vm1, %v2343_v61 }
  0xe8   : > { %v2335_v63 = vpop.permute.xlu0 %2334  ;;  %2990 = vmatmul.mubr.msk.f32.vlgmr.msra.gmra.mxu0 %vm251_vm2, %v2987_v60 }
  0xe9   : > { %v2345_v0 = vsel %vm2342_vm9, %v2333_v58, %v2335_v63  ;;  %v2346_v1 = vsel %vm2342_vm9, %v2335_v63, %v2337_v62  ;;  %2570 = vmatprep.mubr.f32.mxu0 %v3047_v6 }
  0xea   : > { %2991 = vmatprep.subr.msk.mxu1 %vm255_vm1, %v2346_v1  ;;  %v2341_v2 = vpop.permute.xlu1 %2340 }
  0xeb   : > { %2992 = vmatpush1.msk.msra.mxu1 %vm255_vm1, %v2345_v0 }
  0xec   : > { %v2339_v3 = vpop.permute.xlu0 %2338  ;;  %2993 = vmatmul.mubr.msk.f32.vlgmr.msra.gmra.mxu1 %vm251_vm2, %v2987_v60 }
  0xed   : > { %v2347_v4 = vsel %vm2342_vm9, %v2337_v62, %v2339_v3  ;;  %v2348_v5 = vsel %vm2342_vm9, %v2339_v3, %v2341_v2 }
  0xee   : > { %2994 = vmatprep.subr.msk.mxu0 %vm255_vm1, %v2348_v5 }
  0xef   : > { %2995 = vmatpush1.msk.msra.mxu0 %vm255_vm1, %v2347_v4 }
  0xf0   : > { %2996 = vmatmul.mubr.msk.f32.vlgmr.msra.gmra.mxu0 %vm251_vm2, %v2987_v60 }
 0x148   : > { %v334_v7 = vpop.f32.mrf.mxu0 }
 0x14a   : > { %v336_v8 = vpop.f32.mrf.mxu0 }
 0x14c   : > { %v405_v6 = vpop.f32.mrf.mxu1 }
 0x14e   : > { %v407_v9 = vpop.f32.mrf.mxu1 }
 0x150   : > { %v476_v16 = vpop.f32.mrf.mxu0 }
 0x152   : > { %v478_v18 = vpop.f32.mrf.mxu0 }
 0x155   : > { %v583_v17 = vpop.f32.mrf.mxu1 }
 0x156   : > { %v584_v41 = vadd.f32 %v583_v17, %v334_v7  ;;  %v2586_v7 = vsub.s32 0, %v3364_v59 }
 0x157   : > { %v585_v19 = vpop.f32.mrf.mxu1 }
 0x158   : > { %v654_v20 = vpop.f32.mrf.mxu0  ;;  %v586_v43 = vadd.f32 %v585_v19, %v336_v8 }
 0x159   : > { %v655_v44 = vadd.f32 %v654_v20, %v405_v6 }
 0x15a   : > { %v656_v10 = vpop.f32.mrf.mxu0 }
 0x15b   : > { %v657_v48 = vadd.f32 %v656_v10, %v407_v9 }
 0x15c   : > { %v725_v12 = vpop.f32.mrf.mxu1 }
 0x15d   : > { %v726_v53 = vadd.f32 %v725_v12, %v476_v16  ;;  %v215_v16 = vld [vmem:[%s3476_s1] sm:$0x3f] }
 0x15e   : > { %v727_v21 = vpop.f32.mrf.mxu1 }
 0x15f   : > { %v728_v57 = vadd.f32 %v727_v21, %v478_v18  ;;  %v2590_v18 = vsub.s32 1, %v3364_v59 }
 0x163   : > { %v845_v14 = vpop.f32.mrf.mxu0 }
 0x164   : > { %v992_v46 = vadd.f32 %v845_v14, %v584_v41  ;;  %v2606_v41 = vsub.s32 5, %v3364_v59 }
 0x165   : > { %v847_v22 = vpop.f32.mrf.mxu0 }
 0x166   : > { %v993_v51 = vadd.f32 %v847_v22, %v586_v43 }
 0x168   : > { %v916_v15 = vpop.f32.mrf.mxu1 }
 0x169   : > { %v994_v52 = vadd.f32 %v916_v15, %v655_v44  ;;  %v3371_v15 = vrot.slane %v215_v16, %v2586_v7 }
 0x16a   : > { %v918_v11 = vpop.f32.mrf.mxu1 }
 0x16b   : > { %v995_v58 = vadd.f32 %v918_v11, %v657_v48 }
 0x16c   : > { %v987_v23 = vpop.f32.mrf.mxu0 }
 0x16d   : > { %v996_v63 = vadd.f32 %v987_v23, %v726_v53 }
 0x16e   : > { %v989_v24 = vpop.f32.mrf.mxu0 }
 0x16f   : > { %v997_v2 = vadd.f32 %v989_v24, %v728_v57 }
 0x171   : > { %v1113_v13 = vpop.f32.mrf.mxu1 }
 0x172   : > { %v1260_v55 = vadd.f32 %v1113_v13, %v992_v46  ;;  %v2594_v13 = vsub.s32 2, %v3364_v59 }
 0x173   : > { %v1115_v25 = vpop.f32.mrf.mxu1 }
 0x174   : > { %v1184_v26 = vpop.f32.mrf.mxu0  ;;  %v1261_v60 = vadd.f32 %v1115_v25, %v993_v51  ;;  %v3385_v44 = vrot.slane %v215_v16, %v2594_v13 }
 0x175   : > { %v1262_v61 = vadd.f32 %v1184_v26, %v994_v52  ;;  %v3374_v26 = vrot.slane %v215_v16, %v2590_v18 }
 0x176   : > { %v1186_v28 = vpop.f32.mrf.mxu0 }
 0x177   : > { %v1263_v3 = vadd.f32 %v1186_v28, %v995_v58  ;;  %v3396_v58 = vrot.slane %v215_v16, %v2606_v41 }
 0x178   : > { %v1255_v27 = vpop.f32.mrf.mxu1 }
 0x179   : > { %v1358_v30 = vpop.f32.mrf.mxu0  ;;  %v1264_v17 = vadd.f32 %v1255_v27, %v996_v63  ;;  %v2598_v27 = vsub.s32 3, %v3364_v59 }
 0x17a   : > { %v1257_v29 = vpop.f32.mrf.mxu1  ;;  %v1505_v1 = vadd.f32 %v1358_v30, %v1260_v55 }
 0x17b   : > { %v1360_v32 = vpop.f32.mrf.mxu0  ;;  %v1265_v12 = vadd.f32 %v1257_v29, %v997_v2  ;;  %v2602_v29 = vsub.s32 4, %v3364_v59  ;;  %v3387_v50 = vrot.slane %v215_v16, %v2598_v27 }
 0x17c   : > { %v1429_v31 = vpop.f32.mrf.mxu1  ;;  %v1506_v6 = vadd.f32 %v1360_v32, %v1261_v60 }
 0x17d   : > { %v1500_v34 = vpop.f32.mrf.mxu0  ;;  %v1507_v8 = vadd.f32 %v1429_v31, %v1262_v61  ;;  %v3394_v51 = vrot.slane %v215_v16, %v2602_v29 }
 0x17e   : > { %v1431_v33 = vpop.f32.mrf.mxu1  ;;  %v1509_v24 = vadd.f32 %v1500_v34, %v1264_v17 }
 0x17f   : > { %v1502_v36 = vpop.f32.mrf.mxu0  ;;  %v1508_v10 = vadd.f32 %v1431_v33, %v1263_v3 }
 0x180   : > { %v1510_v32 = vadd.f32 %v1502_v36, %v1265_v12 }
 0x181   : > { %v1697_v38 = vpop.f32.mrf.mxu0 }
 0x182   : > { %v1775_v22 = vadd.f32 %v1697_v38, %v1507_v8 }
 0x183   : > { %v1626_v35 = vpop.f32.mrf.mxu1  ;;  %v1699_v40 = vpop.f32.mrf.mxu0 }
 0x184   : > { %v1773_v9 = vadd.f32 %v1626_v35, %v1505_v1  ;;  %v1776_v33 = vadd.f32 %v1699_v40, %v1508_v10 }
 0x185   : > { %v1628_v37 = vpop.f32.mrf.mxu1 }
 0x186   : > { %v1774_v19 = vadd.f32 %v1628_v37, %v1506_v6 }
 0x188   : > { %v1768_v39 = vpop.f32.mrf.mxu1 }
 0x189   : > { %v1777_v35 = vadd.f32 %v1768_v39, %v1509_v24 }
 0x18a   : > { %v1770_v45 = vpop.f32.mrf.mxu1 }
 0x18b   : > { %v1778_v46 = vadd.f32 %v1770_v45, %v1510_v32 }
 0x18c   : > { %v1894_v42 = vpop.f32.mrf.mxu0 }
 0x18d   : > { %v2041_v20 = vadd.f32 %v1894_v42, %v1773_v9 }
 0x18e   : > { %v1896_v49 = vpop.f32.mrf.mxu0 }
 0x18f   : > { %v2042_v11 = vadd.f32 %v1896_v49, %v1774_v19 }
 0x190   : > { %v1965_v47 = vpop.f32.mrf.mxu1 }
 0x191   : > { %v2043_v28 = vadd.f32 %v1965_v47, %v1775_v22 }
 0x192   : > { %v1967_v56 = vpop.f32.mrf.mxu1 }
 0x193   : > { %v2044_v47 = vadd.f32 %v1967_v56, %v1776_v33  ;;  %v3055_v33 = vmov 0  }
 0x194   : > { %v2036_v54 = vpop.f32.mrf.mxu0  ;;  %3023 = vset.pattern.permute.xlu1 %v3055_v33 }
 0x195   : > { %v2045_v48 = vadd.f32 %v2036_v54, %v1777_v35 }
 0x196   : > { %v2038_v0 = vpop.f32.mrf.mxu0 }
 0x197   : > { %v2046_v52 = vadd.f32 %v2038_v0, %v1778_v46 }
 0x19c   : > { %v2233_v4 = vpop.f32.mrf.mxu0 }
 0x19d   : > { %v2311_v42 = vadd.f32 %v2233_v4, %v2043_v28 }
 0x19e   : > { %v2235_v21 = vpop.f32.mrf.mxu0 }
 0x19f   : > { %v2162_v62 = vpop.f32.mrf.mxu1  ;;  %v2312_v53 = vadd.f32 %v2235_v21, %v2044_v47 }
 0x1a0   : > { %v2309_v23 = vadd.f32 %v2162_v62, %v2041_v20 }
 0x1a1   : > { %v2164_v5 = vpop.f32.mrf.mxu1 }
 0x1a2   : > { %v2310_v30 = vadd.f32 %v2164_v5, %v2042_v11 }
 0x1a4   : > { %v2304_v14 = vpop.f32.mrf.mxu1 }
 0x1a5   : > { %v2313_v55 = vadd.f32 %v2304_v14, %v2045_v48  ;;  %v3056_v48 = vmov 1  }
 0x1a6   : > { %v2306_v37 = vpop.f32.mrf.mxu1  ;;  %3024 = vset.pattern.permute.xlu0 %v3056_v48 }
 0x1a7   : > { %v2314_v61 = vadd.f32 %v2306_v37, %v2046_v52 }
 0x1a8   : > { %v2430_v25 = vpop.f32.mrf.mxu0 }
 0x1a9   : > { %v3377_v31 = vadd.f32 %v2430_v25, %v2309_v23 }
 0x1aa   : > { %v2432_v38 = vpop.f32.mrf.mxu0 }
 0x1ab   : > { %v2614_v34 = vmul.f32 %v3371_v15, %v3377_v31  ;;  %v3383_v43 = vadd.f32 %v2432_v38, %v2310_v30 }
 0x1ac   : > { %v2501_v49 = vpop.f32.mrf.mxu1 }
 0x1ad   : > { %v2633_v36 = vmul.f32 %v2614_v34, %v3377_v31  ;;  %v2615_v39 = vmul.f32 %v3374_v26, %v3383_v43  ;;  %v3392_v40 = vadd.f32 %v2501_v49, %v2311_v42  ;;  %v2620_v45 = vsel %vm255_vm1, %v2614_v34, 0.0  ;;  %v3421_v49 = vld [vmem:[%s209_s11] sm:$0xf] }
 0x1ae   : > { %v2503_v57 = vpop.f32.mrf.mxu1 }
 0x1af   : > { %v2621_v54 = vsel %vm255_vm1, %v2615_v39, 0.0  ;;  %v2634_v56 = vmul.f32 %v2615_v39, %v3383_v43  ;;  %v2616_v60 = vmul.f32 %v3385_v44, %v3392_v40  ;;  %v2639_v62 = vsel %vm255_vm1, %v2633_v36, 0.0 }
 0x1b0   : > { %v2622_v63 = vadd.f32 %v2621_v54, %v2620_v45  ;;  %v2580_v1 = vadd.f32 %v2503_v57, %v2312_v53  ;;  %v2572_v0 = vpop.f32.mrf.mxu0 }
 0x1b1   : > { %v2640_v2 = vsel %vm255_vm1, %v2634_v56, 0.0  ;;  %v2623_v3 = vsel %vm255_vm1, %v2616_v60, 0.0  ;;  %v2635_v4 = vmul.f32 %v2616_v60, %v3392_v40  ;;  %v2581_v5 = vadd.f32 %v2572_v0, %v2313_v55 }
 0x1b2   : > { %v2641_v7 = vadd.f32 %v2640_v2, %v2639_v62  ;;  %v2617_v6 = vmul.f32 %v3387_v50, %v2580_v1  ;;  %v2574_v8 = vpop.f32.mrf.mxu0  ;;  %v2624_v9 = vadd.f32 %v2623_v3, %v2622_v63 }
 0x1b3   : > { %v2642_v16 = vsel %vm255_vm1, %v2635_v4, 0.0  ;;  %v2618_v17 = vmul.f32 %v3394_v51, %v2581_v5  ;;  %v2582_v18 = vadd.f32 %v2574_v8, %v2314_v61 }
 0x1b4   : > { %v2636_v19 = vmul.f32 %v2617_v6, %v2580_v1  ;;  %v2625_v20 = vsel %vm255_vm1, %v2617_v6, 0.0  ;;  %v2643_v12 = vadd.f32 %v2642_v16, %v2641_v7  ;;  %v2713_v7 = vcombine.low %v3371_v15, %v3374_v26 }
 0x1b5   : > { %v2637_v10 = vmul.f32 %v2618_v17, %v2581_v5  ;;  %v2619_v21 = vmul.f32 %v3396_v58, %v2582_v18  ;;  %v2626_v14 = vadd.f32 %v2625_v20, %v2624_v9  ;;  %v2627_v22 = vsel %vm255_vm1, %v2618_v17, 0.0 }
 0x1b6   : > { %v2644_v11 = vsel %vm255_vm1, %v2636_v19, 0.0  ;;  %v2714_v6 = vcombine.low %v3385_v44, %v3387_v50  ;;  %v2715_v17 = vcombine.low %v3394_v51, %v3396_v58 }
 0x1b7   : > { %v2628_v23 = vadd.f32 %v2627_v22, %v2626_v14  ;;  %v2629_v13 = vsel %vm255_vm1, %v2619_v21, 0.0  ;;  %v2638_v24 = vmul.f32 %v2619_v21, %v2582_v18  ;;  %v2645_v25 = vadd.f32 %v2644_v11, %v2643_v12 }
 0x1b8   : > { %v2646_v27 = vsel %vm255_vm1, %v2637_v10, 0.0 }
 0x1b9   : > { %v2630_v28 = vadd.f32 %v2629_v13, %v2628_v23  ;;  %v2647_v30 = vadd.f32 %v2646_v27, %v2645_v25  ;;  %v2648_v29 = vsel %vm255_vm1, %v2638_v24, 0.0 }
 0x1bb   : > { %2631 = vadd.xlane.f32.xlu0 %v2630_v28  ;;  %v2649_v32 = vadd.f32 %v2648_v29, %v2647_v30 }
 0x1bd   : > { %2650 = vadd.xlane.f32.xlu1 %v2649_v32 }
 0x244   : > { %v2632_v35 = vpop.xlane.xlu0 %2631 }
 0x245   : > { %v2652_v37 = vmul.f32 0.001953125, %v2632_v35 }
 0x246   : > { %v2651_v38 = vpop.xlane.xlu1 %2650 }
 0x247   : > { %v2654_v41 = vmul.f32 %v2652_v37, %v2652_v37  ;;  %v2653_v42 = vmul.f32 0.001953125, %v2651_v38 }
 0x249   : > { %v2655_v34 = vsub.f32 %v2653_v42, %v2654_v41 }
 0x24b   : > { %v2656_v46 = vmax.f32 %v2655_v34, 0.0 }
 0x24d   : > { %v2658_v47 = vadd.f32 1e-05, %v2656_v46 }
 0x24f   : > { %3034 = vrsqrt.f32 %v2658_v47 }
 0x25c   : > { %v3035_v36 = vpop.eup %3034 }
 0x25d   : > { %v2660_v39 = vmul.f32 %v3035_v36, %v3421_v49 }
 0x25f   : > { %2669 = vperm.xlu1 %3023, %v2660_v39   ;;  %v2661_v52 = vmul.f32 %v2660_v39, %v2652_v37 }
 0x261   : > { %2663 = vrot.lane.b32.xlu0 %v2661_v52, %s3050_s30 }
 0x2d3   : > { %v2664_v53 = vpop.permute.xlu0 %2663 }
 0x2d4   : > { %v2666_v55 = vsub.f32 %v3421_v49, %v2664_v53  ;;  %v3057_v53 = vmov 2  }
 0x2d6   : > { %2680 = vperm.xlu0 %3024, %v2666_v55  }
 0x2da   : > { %v2670_v57 = vpop.permute.xlu1 %2669  ;;  %3025 = vset.pattern.permute.xlu0 %v3057_v53 }
 0x2db   : > { %v2672_v45 = vmul.f32 %v2670_v57, %v3377_v31  ;;  %v2673_v54 = vmul.f32 %v2670_v57, %v3383_v43  ;;  %v2674_v56 = vmul.f32 %v2670_v57, %v3392_v40  ;;  %v2675_v60 = vmul.f32 %v2670_v57, %v2580_v1 }
 0x2dc   : > { %v2676_v61 = vmul.f32 %v2670_v57, %v2581_v5  ;;  %v2677_v62 = vmul.f32 %v2670_v57, %v2582_v18 }
 0x351   : > { %v2681_v63 = vpop.permute.xlu0 %2680 }
 0x352   : > { %v2683_v0 = vadd.f32 %v2681_v63, %v2672_v45  ;;  %v2684_v2 = vadd.f32 %v2681_v63, %v2673_v54  ;;  %v2685_v3 = vadd.f32 %v2681_v63, %v2674_v56  ;;  %v2686_v4 = vadd.f32 %v2681_v63, %v2675_v60 }
 0x353   : > { %v2687_v8 = vadd.f32 %v2681_v63, %v2676_v61  ;;  %v2688_v31 = vadd.f32 %v2681_v63, %v2677_v62 }
 0x354   : > { %v2689_v9 = vmax.f32 %v2683_v0, 0.0  ;;  %v2690_v43 = vmax.f32 %v2684_v2, 0.0  ;;  %v2691_v16 = vmax.f32 %v2685_v3, 0.0  ;;  %v2692_v40 = vmax.f32 %v2686_v4, 0.0 }
 0x355   : > { %v2693_v1 = vmax.f32 %v2687_v8, 0.0  ;;  %v2694_v5 = vmax.f32 %v2688_v31, 0.0 }
 0x356   : > { %v3435_v18 = vcombine.low %v2689_v9, %v2690_v43  ;;  %v3437_v19 = vcombine.low %v2691_v16, %v2692_v40 }
 0x357   : > { %v3439_v20 = vcombine.low %v2693_v1, %v2694_v5  ;;  %v3058_v5 = vmov 3  }
 0x358   : > { %v2719_v15 = vmul.f32 %v2713_v7, %v3435_v18  ;;  %v2720_v26 = vmul.f32 %v2714_v6, %v3437_v19  ;;  %3026 = vset.pattern.permute.xlu1 %v3058_v5 }
 0x359   : > { %v2721_v44 = vmul.f32 %v2715_v17, %v3439_v20 }
 0x35a   : > { %v2725_v50 = vcombine.high %v2719_v15, %v2719_v15  ;;  %v2744_v12 = vmul.f32 %v2719_v15, %v3435_v18  ;;  %v2745_v10 = vmul.f32 %v2720_v26, %v3437_v19  ;;  %v2726_v21 = vcombine.high %v2720_v26, %v2720_v26 }
 0x35b   : > { %v2731_v51 = vsel %vm255_vm1, %v2719_v15, 0.0  ;;  %v2734_v11 = vsel %vm255_vm1, %v2720_v26, 0.0  ;;  %v2746_v23 = vmul.f32 %v2721_v44, %v3439_v20  ;;  %v2727_v28 = vcombine.high %v2721_v44, %v2721_v44 }
 0x35c   : > { %v2732_v58 = vsel %vm255_vm1, %v2725_v50, 0.0  ;;  %v2750_v22 = vcombine.high %v2744_v12, %v2744_v12  ;;  %v2751_v24 = vcombine.high %v2745_v10, %v2745_v10  ;;  %v2756_v25 = vsel %vm255_vm1, %v2744_v12, 0.0 }
 0x35d   : > { %v2733_v14 = vadd.f32 %v2732_v58, %v2731_v51  ;;  %v2736_v30 = vsel %vm255_vm1, %v2726_v21, 0.0  ;;  %v2759_v33 = vsel %vm255_vm1, %v2745_v10, 0.0  ;;  %v2738_v35 = vsel %vm255_vm1, %v2721_v44, 0.0 }
 0x35e   : > { %v2757_v27 = vsel %vm255_vm1, %v2750_v22, 0.0  ;;  %v2752_v41 = vcombine.high %v2746_v23, %v2746_v23  ;;  %v2761_v42 = vsel %vm255_vm1, %v2751_v24, 0.0  ;;  %v2740_v34 = vsel %vm255_vm1, %v2727_v28, 0.0 }
 0x35f   : > { %v2735_v13 = vadd.f32 %v2734_v11, %v2733_v14  ;;  %v2758_v29 = vadd.f32 %v2757_v27, %v2756_v25  ;;  %v2763_v48 = vsel %vm255_vm1, %v2746_v23, 0.0  ;;  %v3059_v12 = vmov 839922192  }
 0x360   : > { %v2765_v39 = vsel %vm255_vm1, %v2752_v41, 0.0  ;;  %v2802_v10 = vunpack.c.l.s4 %v3059_v12 }
 0x361   : > { %v2737_v32 = vadd.f32 %v2736_v30, %v2735_v13  ;;  %v2760_v37 = vadd.f32 %v2759_v33, %v2758_v29 }
 0x362   : > { %v2803_v21 = vunpack.c.0.s8 %v2802_v10 }
 0x363   : > { %v2739_v38 = vadd.f32 %v2738_v35, %v2737_v32  ;;  %v2762_v46 = vadd.f32 %v2761_v42, %v2760_v37 }
 0x364   : > { %v2806_v51 = vsub.s32 %v2803_v21, %v3364_v59 }
 0x365   : > { %v2741_v47 = vadd.f32 %v2740_v34, %v2739_v38  ;;  %v2764_v36 = vadd.f32 %v2763_v48, %v2762_v46 }
 0x367   : > { %2742 = vadd.xlane.f32.xlu1 %v2741_v47  ;;  %v2766_v52 = vadd.f32 %v2765_v39, %v2764_v36 }
 0x369   : > { %2767 = vadd.xlane.f32.xlu0 %v2766_v52 }
 0x3f0   : > { %v2743_v55 = vpop.xlane.xlu1 %2742 }
 0x3f1   : > { %v2769_v57 = vsel %vm255_vm1, %v2743_v55, 0.0 }
 0x3f2   : > { %v2770_v45 = vrot.slane %v2769_v57, 4  ;;  %v2768_v54 = vpop.xlane.xlu0 %2767 }
 0x3f3   : > { %v2777_v60 = vsel %vm255_vm1, %v2768_v54, 0.0 }
 0x3f4   : > { %v2771_v56 = vadd.f32 %v2770_v45, %v2769_v57  ;;  %v2778_v61 = vrot.slane %v2777_v60, 4 }
 0x3f6   : > { %v2772_v62 = vrot.slane %v2771_v56, 2  ;;  %v2779_v63 = vadd.f32 %v2778_v61, %v2777_v60 }
 0x3f8   : > { %v2773_v0 = vadd.f32 %v2772_v62, %v2771_v56  ;;  %v2780_v2 = vrot.slane %v2779_v63, 2 }
 0x3fa   : > { %v2774_v3 = vrot.slane %v2773_v0, 1  ;;  %v2781_v4 = vadd.f32 %v2780_v2, %v2779_v63 }
 0x3fc   : > { %v2775_v7 = vadd.f32 %v2774_v3, %v2773_v0  ;;  %v2782_v6 = vrot.slane %v2781_v4, 1 }
 0x3fe   : > { %v2776_v8 = vmul.f32 0.00048828125, %v2775_v7  ;;  %v2783_v31 = vadd.f32 %v2782_v6, %v2781_v4 }
 0x400   : > { %v2785_v9 = vmul.f32 %v2776_v8, %v2776_v8  ;;  %v2784_v43 = vmul.f32 0.00048828125, %v2783_v31 }
 0x402   : > { %v2786_v16 = vsub.f32 %v2784_v43, %v2785_v9 }
 0x404   : > { %v2787_v40 = vmax.f32 %v2786_v16, 0.0 }
 0x406   : > { %v2788_v1 = vadd.f32 1e-05, %v2787_v40 }
 0x408   : > { %3036 = vrsqrt.f32 %v2788_v1 }
 0x415   : > { %v3037_v17 = vpop.eup %3036 }
 0x416   : > { %v2790_v15 = vmul.f32 %v3037_v17, %v3421_v49 }
 0x418   : > { %2799 = vperm.xlu0 %3025, %v2790_v15   ;;  %v2791_v26 = vmul.f32 %v2790_v15, %v2776_v8 }
 0x41a   : > { %2793 = vrot.lane.b32.xlu1 %v2791_v26, %s3050_s30 }
 0x41c   : > { %3027 = vset.pattern.permute.xlu0 %v3058_v5 }
 0x48c   : > { %v2794_v44 = vpop.permute.xlu1 %2793 }
 0x48d   : > { %v2796_v50 = vsub.f32 %v3421_v49, %v2794_v44 }
 0x48f   : > { %2814 = vperm.xlu1 %3026, %v2796_v50  }
 0x493   : > { %v2800_v58 = vpop.permute.xlu0 %2799 }
 0x494   : > { %v2807_v14 = vrot.slane %v2800_v58, %v2806_v51 }
 0x496   : > { %v2809_v11 = vmul.f32 %v2807_v14, %v3435_v18  ;;  %v2810_v23 = vmul.f32 %v2807_v14, %v3437_v19  ;;  %v2811_v13 = vmul.f32 %v2807_v14, %v3439_v20 }
 0x50a   : > { %v2815_v22 = vpop.permute.xlu1 %2814 }
 0x50b   : > { %v2822_v24 = vrot.slane %v2815_v22, %v2806_v51 }
 0x50d   : > { %v2824_v25 = vadd.f32 %v2822_v24, %v2809_v11  ;;  %v2825_v27 = vadd.f32 %v2822_v24, %v2810_v23  ;;  %v2826_v49 = vadd.f32 %v2822_v24, %v2811_v13 }
 0x50f   : > { %v2827_v28 = vmax.f32 %v2824_v25, 0.0  ;;  %v2828_v59 = vmax.f32 %v2825_v27, 0.0  ;;  %v2829_v30 = vmax.f32 %v2826_v49, 0.0 }
 0x511   : > { %2830 = vst [vmem:[%s214_s14] sm:$0xff] %v2827_v28  ;;  %2831 = vst [vmem:[%s214_s14 + $0x8] sm:$0xff] %v2828_v59 }
 0x512   : > { %2832 = vst [vmem:[%s214_s14 + $0x10] sm:$0xff] %v2829_v30 }
 0x513 PF: > { %s14_s15 = sadd.s32 1, %s3044_s15  }
 0x514   : > { %p11_p4 = scmp.ge.s32.totalorder %s14_s15, 6  }
 0x516   :  { %13 = sbr.rel (!%p11_p4) target bundleno = 1 (0x1), region = 77 }

</bundles_post_ra>
